<compile_context>
chip_gen: v5e
topology: v5e:2x2
jax: 0.10.0
libtpu: 0.0.40
codegen_flags: <defaults>
</compile_context>

<pallas_src>
import functools

import jax
import jax.numpy as jnp
import numpy as np
from jax.experimental import pallas as pl
from jax.experimental.pallas import tpu as pltpu


def _pcca_kernel(x_ref, pool_ref, expand_ref, wmat_ref, bias_ref, o_ref,
                 *, C, H, W, B_blk):
    L = W + H

    xf = x_ref[...].astype(jnp.float32)                        # (R, HW) lane-dense

    # ---- pooled stats via one MXU dot (no minor-dim reshape needed) --------
    # pool[:, :W]: (l % W == w)/H  -> mean over H (col_avg, indexed by W)
    # pool[:, W:]: (l // W == h)/W -> mean over W (row_avg, indexed by H)
    pooled = jnp.dot(xf, pool_ref[...], preferred_element_type=jnp.float32)  # (R, L)
    p_avg = jnp.mean(pooled[:, :W], axis=1, keepdims=True)      # (R, 1) global mean
    p_max = jnp.max(xf, axis=1, keepdims=True)                  # (R, 1) global max
    p = p_avg + p_max

    wd1 = wmat_ref[0]          # (2C, 2C) block-diag [[bn*wc, 0], [0, wpca]]
    wd2 = wmat_ref[1]          # (2C, 2C) block-diag [[w1,    0], [0, w2  ]]
    bias1 = bias_ref[0]        # (2C, 1)  [bn*bc+shift ; bpca]
    bias2 = bias_ref[1]        # (2C, 1)  [b1 ; b2]

    s1_parts, s2_parts, pca_parts = [], [], []
    for b in range(B_blk):                                      # static, small
        pooled_b = pooled[b * C:(b + 1) * C]                    # (C, L)
        p_b = p[b * C:(b + 1) * C]                              # (C, 1)

        # stage 1: CA conv(+BN fold) and PCA matvec in one block-diag dot
        rhs1 = jnp.concatenate(
            [pooled_b, jnp.broadcast_to(p_b, (C, L))], axis=0)  # (2C, L)
        t1 = jnp.dot(wd1, rhs1, preferred_element_type=jnp.float32) + bias1
        z = t1[:C]
        z = z * jax.nn.sigmoid(z)                               # SiLU
        pca_parts.append(t1[C:, 0:1])                           # (C, 1) out_pca

        # stage 2: conv_1 / conv_2 merged into one block-diag dot
        rhs2 = jnp.concatenate([z[:, :W], z[:, W:]], axis=0)    # (2C, W)
        t2 = jnp.dot(wd2, rhs2, preferred_element_type=jnp.float32) + bias2
        s12 = jax.nn.sigmoid(t2)                                # (2C, W)
        s1_parts.append(s12[:C])                                # (C, W) indexed by w
        s2_parts.append(s12[C:])                                # (C, H) indexed by h

    s1 = jnp.concatenate(s1_parts, axis=0)                      # (R, W)
    s2 = jnp.concatenate(s2_parts, axis=0)                      # (R, H)
    out_pca = jnp.concatenate(pca_parts, axis=0)                # (R, 1)

    # ---- broadcast s1/s2 back to (R, HW) with 0/1 selection matmuls --------
    s1_flat = jnp.dot(s1, expand_ref[:W, :], preferred_element_type=jnp.float32)
    s2_flat = jnp.dot(s2, expand_ref[W:, :], preferred_element_type=jnp.float32)

    # ---- fuse: sigmoid(x*pca + x*s1*s2) * x  (tanh form: 1 EUP op/elt) -----
    t = xf * (out_pca + s1_flat * s2_flat)
    y = (0.5 * jnp.tanh(0.5 * t) + 0.5) * xf
    o_ref[...] = y.astype(o_ref.dtype)


def _choose_b_blk(B, C, HW, itemsize, vmem_budget_bytes=24 << 20):
    per_b = 4 * C * HW * itemsize            # in + out blocks, double-buffered
    b_blk = max(1, min(B, vmem_budget_bytes // max(per_b, 1)))
    while b_blk > 1 and B // b_blk < 2:      # keep >= 2 grid steps (v7x: 2 TCs)
        b_blk -= 1
    while B % b_blk:
        b_blk -= 1
    if (b_blk * C) % 8 != 0 and b_blk != B:  # keep the sublane dim legal
        b_blk = B
    return b_blk


def _const_spec(arr):
    nd = arr.ndim
    return pl.BlockSpec(arr.shape, lambda b: (0,) * nd)


def pcca_forward(x, packed):
    pool_mat, expand_mat, wmats, biases = packed
    B, C, H, W = x.shape
    assert H == W, "reference torch.split-at-mid semantics require H == W"
    HW = H * W
    x2 = x.reshape(B * C, HW)                # free metadata reshape in XLA

    b_blk = _choose_b_blk(B, C, HW, x.dtype.itemsize)
    R = b_blk * C
    grid = (B // b_blk,)

    x_spec = pl.BlockSpec((R, HW), lambda b: (b, 0))

    # explicit VMEM budget (matters at production sizes on v7x's 64 MiB VMEM)
    const_bytes = 4 * (pool_mat.size + expand_mat.size + wmats.size + biases.size)
    need = 2 * (2 * R * HW * x.dtype.itemsize) + 2 * const_bytes + (2 << 20)
    vmem_limit = int(min(max(need, 16 << 20), 48 << 20))

    kernel = functools.partial(_pcca_kernel, C=C, H=H, W=W, B_blk=b_blk)
    y2 = pl.pallas_call(
        kernel,
        out_shape=jax.ShapeDtypeStruct((B * C, HW), x.dtype),
        grid_spec=pltpu.PrefetchScalarGridSpec(
            num_scalar_prefetch=0,
            grid=grid,
            in_specs=[x_spec,
                      _const_spec(pool_mat),
                      _const_spec(expand_mat),
                      _const_spec(wmats),
                      _const_spec(biases)],
            out_specs=x_spec,
        ),
        compiler_params=pltpu.CompilerParams(
            dimension_semantics=("parallel",),
            vmem_limit_bytes=vmem_limit),
    )(x2, pool_mat, expand_mat, wmats, biases)
    return y2.reshape(B, C, H, W)


def make_params(key, C, dtype=jnp.float32):
    ks = jax.random.split(key, 12)
    s = 0.1
    w1d_1 = s * jax.random.normal(ks[0], (C, C, 1), dtype)
    w1d_3 = s * jax.random.normal(ks[1], (C, C, 3), dtype)
    w1d_5 = s * jax.random.normal(ks[2], (C, C, 5), dtype)
    b1d_1 = s * jax.random.normal(ks[3], (C,), dtype)
    b1d_3 = s * jax.random.normal(ks[4], (C,), dtype)
    b1d_5 = s * jax.random.normal(ks[5], (C,), dtype)
    # length-1 sequence: only the center tap of each Conv1d sees real input
    wpca = w1d_1[:, :, 0] + w1d_3[:, :, 1] + w1d_5[:, :, 2]
    bpca = 2.0 * (b1d_1 + b1d_3 + b1d_5)

    wc = s * jax.random.normal(ks[6], (C, C), dtype)
    bc = s * jax.random.normal(ks[7], (C,), dtype)
    # BatchNorm2d in eval mode with default stats (mean=0, var=1, g=1, b=0)
    eps = 1e-5
    bn_scale = jnp.ones((C,), dtype) / jnp.sqrt(1.0 + eps)
    bn_shift = jnp.zeros((C,), dtype)
    w1 = s * jax.random.normal(ks[8], (C, C), dtype)
    b1 = s * jax.random.normal(ks[9], (C,), dtype)
    w2 = s * jax.random.normal(ks[10], (C, C), dtype)
    b2 = s * jax.random.normal(ks[11], (C,), dtype)
    return dict(wpca=wpca, bpca=bpca, wc=wc, bc=bc, bn_scale=bn_scale,
                bn_shift=bn_shift, w1=w1, b1=b1, w2=w2, b2=b2)


def pack_params(p, H, W, dtype=jnp.float32):
    C = p["wc"].shape[0]
    HW = H * W
    l = jnp.arange(HW)
    w_idx, h_idx = l % W, l // W
    col_sel = (w_idx[:, None] == jnp.arange(W)[None, :]).astype(dtype)   # (HW, W)
    row_sel = (h_idx[:, None] == jnp.arange(H)[None, :]).astype(dtype)   # (HW, H)
    pool_mat = jnp.concatenate([col_sel / H, row_sel / W], axis=1)       # (HW, W+H)
    expand_mat = jnp.concatenate([col_sel.T, row_sel.T], axis=0)         # (W+H, HW)

    # fold eval-mode BN into the CA 1x1 conv
    wc_bn = p["bn_scale"][:, None] * p["wc"]
    bc_bn = p["bn_scale"] * p["bc"] + p["bn_shift"]

    z = jnp.zeros((C, C), dtype)
    wd1 = jnp.block([[wc_bn, z], [z, p["wpca"]]])                        # (2C, 2C)
    wd2 = jnp.block([[p["w1"], z], [z, p["w2"]]])                        # (2C, 2C)
    wmats = jnp.stack([wd1, wd2])                                        # (2, 2C, 2C)
    biases = jnp.stack([jnp.concatenate([bc_bn, p["bpca"]])[:, None],
                        jnp.concatenate([p["b1"], p["b2"]])[:, None]])   # (2, 2C, 1)
    return pool_mat, expand_mat, wmats, biases


def pcca_reference(x, p):
    """Pure-JAX reference with the original (unfolded) math for validation."""
    B, C, H, W = x.shape
    col_avg = jnp.mean(x, axis=2)                         # (B, C, W)  mean over H
    row_avg = jnp.mean(x, axis=3)                         # (B, C, H)  mean over W
    pooled = jnp.mean(x, axis=(2, 3)) + jnp.max(x, axis=(2, 3))          # (B, C)
    out_pca = jnp.einsum('oc,bc->bo', p["wpca"], pooled) + p["bpca"]

    combined = jnp.concatenate([col_avg, row_avg], axis=2)               # (B, C, W+H)
    z = jnp.einsum('oc,bcl->bol', p["wc"], combined) + p["bc"][:, None]
    z = z * p["bn_scale"][:, None] + p["bn_shift"][:, None]
    z = z * jax.nn.sigmoid(z)
    mid = (W + H) // 2
    s1 = jax.nn.sigmoid(jnp.einsum('oc,bcl->bol', p["w1"], z[..., :mid])
                        + p["b1"][:, None])
    s2 = jax.nn.sigmoid(jnp.einsum('oc,bcl->bol', p["w2"], z[..., mid:])
                        + p["b2"][:, None])
    factor = out_pca[:, :, None, None] + s2[:, :, :, None] * s1[:, :, None, :]
    return jax.nn.sigmoid(x * factor) * x


if __name__ == "__main__":
    B, C, H, W = 2, 8, 16, 16
    key = jax.random.PRNGKey(0)
    kx, kp = jax.random.split(key)
    x = jax.random.normal(kx, (B, C, H, W), jnp.float32)
    params = make_params(kp, C)
    packed = pack_params(params, H, W)

    y = jax.block_until_ready(pcca_forward(x, packed))

    y_ref = pcca_reference(x, params)
    np.testing.assert_allclose(np.asarray(y), np.asarray(y_ref),
                               rtol=1e-4, atol=1e-4)
    print("KERNEL_OK")
</pallas_src>

<mosaic_0001>
module attributes {stable_mosaic.version = 11 : i64} {
  func.func @_pcca_kernel(%arg0: i32, %arg1: memref<8x256xf32, #tpu.memory_space<vmem>>, %arg2: memref<256x32xf32, #tpu.memory_space<vmem>>, %arg3: memref<32x256xf32, #tpu.memory_space<vmem>>, %arg4: memref<2x16x16xf32, #tpu.memory_space<vmem>>, %arg5: memref<2x16x1xf32, #tpu.memory_space<vmem>>, %arg6: memref<8x256xf32, #tpu.memory_space<vmem>>) attributes {dimension_semantics = [#tpu.dimension_semantics<parallel>], iteration_bounds = array<i64: 2>, scalar_prefetch = 0 : i64, scratch_operands = 0 : i64, tpu.core_type = #tpu.core_type<tc>, window_params = [{transform_indices = @transform_0, window_bounds = array<i64: 8, 256>}, {pipeline_mode = #tpu.pipeline_mode<synchronous>, transform_indices = @transform_1, window_bounds = array<i64: 256, 32>}, {pipeline_mode = #tpu.pipeline_mode<synchronous>, transform_indices = @transform_2, window_bounds = array<i64: 32, 256>}, {pipeline_mode = #tpu.pipeline_mode<synchronous>, transform_indices = @transform_3, window_bounds = array<i64: 2, 16, 16>}, {pipeline_mode = #tpu.pipeline_mode<synchronous>, transform_indices = @transform_4, window_bounds = array<i64: 2, 16, 1>}, {transform_indices = @transform_5, window_bounds = array<i64: 8, 256>}]} {
    %c0 = arith.constant 0 : index
    %c0_0 = arith.constant 0 : index
    %0 = vector.load %arg1[%c0, %c0_0] : memref<8x256xf32, #tpu.memory_space<vmem>>, vector<8x256xf32>
    %c0_1 = arith.constant 0 : index
    %c0_2 = arith.constant 0 : index
    %1 = vector.load %arg2[%c0_1, %c0_2] : memref<256x32xf32, #tpu.memory_space<vmem>>, vector<256x32xf32>
    %cst = arith.constant dense<0.000000e+00> : vector<8x32xf32>
    %2 = tpu.matmul %0, %1, %cst {dimension_numbers = #tpu.dot_dimension_numbers<[1], [0], [0], [1], [0, 0, 1, 1], [], []>} : vector<8x256xf32>, vector<256x32xf32>, vector<8x32xf32> -> vector<8x32xf32>
    %3 = vector.extract_strided_slice %2 {offsets = [0, 0], sizes = [8, 16], strides = [1, 1]} : vector<8x32xf32> to vector<8x16xf32>
    %cst_3 = arith.constant dense<0.000000e+00> : vector<8xf32>
    %4 = vector.multi_reduction <add>, %3, %cst_3 [1] : vector<8x16xf32> to vector<8xf32>
    %5 = vector.shape_cast %4 : vector<8xf32> to vector<8x1xf32>
    %cst_4 = arith.constant 1.600000e+01 : f32
    %6 = vector.broadcast %cst_4 : f32 to vector<8x1xf32>
    %7 = arith.divf %5, %6 : vector<8x1xf32>
    %cst_5 = arith.constant dense<0xFF800000> : vector<8xf32>
    %8 = vector.multi_reduction <maximumf>, %0, %cst_5 [1] : vector<8x256xf32> to vector<8xf32>
    %9 = vector.shape_cast %8 : vector<8xf32> to vector<8x1xf32>
    %10 = arith.addf %7, %9 : vector<8x1xf32>
    %c0_6 = arith.constant 0 : index
    %c0_7 = arith.constant 0 : index
    %c0_8 = arith.constant 0 : index
    %11 = vector.load %arg4[%c0_6, %c0_7, %c0_8] : memref<2x16x16xf32, #tpu.memory_space<vmem>>, vector<1x16x16xf32>
    %12 = vector.shape_cast %11 : vector<1x16x16xf32> to vector<16x16xf32>
    %c1 = arith.constant 1 : index
    %c0_9 = arith.constant 0 : index
    %c0_10 = arith.constant 0 : index
    %13 = vector.load %arg4[%c1, %c0_9, %c0_10] : memref<2x16x16xf32, #tpu.memory_space<vmem>>, vector<1x16x16xf32>
    %14 = vector.shape_cast %13 : vector<1x16x16xf32> to vector<16x16xf32>
    %c0_11 = arith.constant 0 : index
    %c0_12 = arith.constant 0 : index
    %c0_13 = arith.constant 0 : index
    %15 = vector.load %arg5[%c0_11, %c0_12, %c0_13] : memref<2x16x1xf32, #tpu.memory_space<vmem>>, vector<1x16x1xf32>
    %16 = vector.shape_cast %15 : vector<1x16x1xf32> to vector<16x1xf32>
    %c1_14 = arith.constant 1 : index
    %c0_15 = arith.constant 0 : index
    %c0_16 = arith.constant 0 : index
    %17 = vector.load %arg5[%c1_14, %c0_15, %c0_16] : memref<2x16x1xf32, #tpu.memory_space<vmem>>, vector<1x16x1xf32>
    %18 = vector.shape_cast %17 : vector<1x16x1xf32> to vector<16x1xf32>
    %19 = vector.shape_cast %10 : vector<8x1xf32> to vector<8x1xf32>
    %20 = vector.broadcast %19 : vector<8x1xf32> to vector<8x32xf32>
    %21 = tpu.concatenate %2, %20 in 0 : vector<8x32xf32>, vector<8x32xf32> -> vector<16x32xf32>
    %cst_17 = arith.constant dense<0.000000e+00> : vector<16x32xf32>
    %22 = tpu.matmul %12, %21, %cst_17 {dimension_numbers = #tpu.dot_dimension_numbers<[1], [0], [0], [1], [0, 0, 1, 1], [], []>} : vector<16x16xf32>, vector<16x32xf32>, vector<16x32xf32> -> vector<16x32xf32>
    %23 = vector.broadcast %16 : vector<16x1xf32> to vector<16x32xf32>
    %24 = arith.addf %22, %23 : vector<16x32xf32>
    %25 = vector.extract_strided_slice %24 {offsets = [0, 0], sizes = [8, 32], strides = [1, 1]} : vector<16x32xf32> to vector<8x32xf32>
    %26 = arith.negf %25 : vector<8x32xf32>
    %27 = math.exp %26 : vector<8x32xf32>
    %cst_18 = arith.constant 1.000000e+00 : f32
    %28 = vector.broadcast %cst_18 : f32 to vector<8x32xf32>
    %29 = arith.addf %28, %27 : vector<8x32xf32>
    %30 = arith.divf %28, %29 : vector<8x32xf32>
    %31 = arith.mulf %25, %30 : vector<8x32xf32>
    %32 = vector.extract_strided_slice %24 {offsets = [8, 0], sizes = [8, 1], strides = [1, 1]} : vector<16x32xf32> to vector<8x1xf32>
    %33 = vector.extract_strided_slice %31 {offsets = [0, 0], sizes = [8, 16], strides = [1, 1]} : vector<8x32xf32> to vector<8x16xf32>
    %34 = vector.extract_strided_slice %31 {offsets = [0, 16], sizes = [8, 16], strides = [1, 1]} : vector<8x32xf32> to vector<8x16xf32>
    %35 = tpu.concatenate %33, %34 in 0 : vector<8x16xf32>, vector<8x16xf32> -> vector<16x16xf32>
    %cst_19 = arith.constant dense<0.000000e+00> : vector<16x16xf32>
    %36 = tpu.matmul %14, %35, %cst_19 {dimension_numbers = #tpu.dot_dimension_numbers<[1], [0], [0], [1], [0, 0, 1, 1], [], []>} : vector<16x16xf32>, vector<16x16xf32>, vector<16x16xf32> -> vector<16x16xf32>
    %37 = vector.broadcast %18 : vector<16x1xf32> to vector<16x16xf32>
    %38 = arith.addf %36, %37 : vector<16x16xf32>
    %39 = arith.negf %38 : vector<16x16xf32>
    %40 = math.exp %39 : vector<16x16xf32>
    %cst_20 = arith.constant 1.000000e+00 : f32
    %41 = vector.broadcast %cst_20 : f32 to vector<16x16xf32>
    %42 = arith.addf %41, %40 : vector<16x16xf32>
    %43 = arith.divf %41, %42 : vector<16x16xf32>
    %44 = vector.extract_strided_slice %43 {offsets = [0, 0], sizes = [8, 16], strides = [1, 1]} : vector<16x16xf32> to vector<8x16xf32>
    %45 = vector.extract_strided_slice %43 {offsets = [8, 0], sizes = [8, 16], strides = [1, 1]} : vector<16x16xf32> to vector<8x16xf32>
    %c0_21 = arith.constant 0 : index
    %c0_22 = arith.constant 0 : index
    %46 = vector.load %arg3[%c0_21, %c0_22] : memref<32x256xf32, #tpu.memory_space<vmem>>, vector<16x256xf32>
    %cst_23 = arith.constant dense<0.000000e+00> : vector<8x256xf32>
    %47 = tpu.matmul %44, %46, %cst_23 {dimension_numbers = #tpu.dot_dimension_numbers<[1], [0], [0], [1], [0, 0, 1, 1], [], []>} : vector<8x16xf32>, vector<16x256xf32>, vector<8x256xf32> -> vector<8x256xf32>
    %c16 = arith.constant 16 : index
    %c0_24 = arith.constant 0 : index
    %48 = vector.load %arg3[%c16, %c0_24] : memref<32x256xf32, #tpu.memory_space<vmem>>, vector<16x256xf32>
    %cst_25 = arith.constant dense<0.000000e+00> : vector<8x256xf32>
    %49 = tpu.matmul %45, %48, %cst_25 {dimension_numbers = #tpu.dot_dimension_numbers<[1], [0], [0], [1], [0, 0, 1, 1], [], []>} : vector<8x16xf32>, vector<16x256xf32>, vector<8x256xf32> -> vector<8x256xf32>
    %50 = arith.mulf %47, %49 : vector<8x256xf32>
    %51 = vector.broadcast %32 : vector<8x1xf32> to vector<8x256xf32>
    %52 = arith.addf %51, %50 : vector<8x256xf32>
    %53 = arith.mulf %0, %52 : vector<8x256xf32>
    %cst_26 = arith.constant 5.000000e-01 : f32
    %54 = vector.broadcast %cst_26 : f32 to vector<8x256xf32>
    %55 = arith.mulf %54, %53 : vector<8x256xf32>
    %56 = math.tanh %55 : vector<8x256xf32>
    %cst_27 = arith.constant 5.000000e-01 : f32
    %57 = vector.broadcast %cst_27 : f32 to vector<8x256xf32>
    %58 = arith.mulf %57, %56 : vector<8x256xf32>
    %cst_28 = arith.constant 5.000000e-01 : f32
    %59 = vector.broadcast %cst_28 : f32 to vector<8x256xf32>
    %60 = arith.addf %58, %59 : vector<8x256xf32>
    %61 = arith.mulf %60, %0 : vector<8x256xf32>
    %c0_29 = arith.constant 0 : index
    %c0_30 = arith.constant 0 : index
    %62 = vector.load %arg6[%c0_29, %c0_30] : memref<8x256xf32, #tpu.memory_space<vmem>>, vector<8x256xf32>
    tpu.vector_store %arg6[%c0_29, %c0_30], %61 {strides = array<i32>} : memref<8x256xf32, #tpu.memory_space<vmem>>, vector<8x256xf32>,
    return
  }
  func.func @transform_0(%arg0: i32) -> (i32, i32) {
    %c0_i32 = arith.constant 0 : i32
    %c0_i32_0 = arith.constant 0 : i32
    return %arg0, %c0_i32 : i32, i32
  }
  func.func @transform_1(%arg0: i32) -> (i32, i32) {
    %c0_i32 = arith.constant 0 : i32
    %c0_i32_0 = arith.constant 0 : i32
    %c0_i32_1 = arith.constant 0 : i32
    return %c0_i32, %c0_i32_0 : i32, i32
  }
  func.func @transform_2(%arg0: i32) -> (i32, i32) {
    %c0_i32 = arith.constant 0 : i32
    %c0_i32_0 = arith.constant 0 : i32
    %c0_i32_1 = arith.constant 0 : i32
    return %c0_i32, %c0_i32_0 : i32, i32
  }
  func.func @transform_3(%arg0: i32) -> (i32, i32, i32) {
    %c0_i32 = arith.constant 0 : i32
    %c0_i32_0 = arith.constant 0 : i32
    %c0_i32_1 = arith.constant 0 : i32
    %c0_i32_2 = arith.constant 0 : i32
    return %c0_i32, %c0_i32_0, %c0_i32_1 : i32, i32, i32
  }
  func.func @transform_4(%arg0: i32) -> (i32, i32, i32) {
    %c0_i32 = arith.constant 0 : i32
    %c0_i32_0 = arith.constant 0 : i32
    %c0_i32_1 = arith.constant 0 : i32
    %c0_i32_2 = arith.constant 0 : i32
    return %c0_i32, %c0_i32_0, %c0_i32_1 : i32, i32, i32
  }
  func.func @transform_5(%arg0: i32) -> (i32, i32) {
    %c0_i32 = arith.constant 0 : i32
    %c0_i32_0 = arith.constant 0 : i32
    return %arg0, %c0_i32 : i32, i32
  }
}

</mosaic_0001>

<bundles_post_ra>
// kernel: tpu_custom_call.1
= control target key start
LH: loop header
LB: loop body
LE: loop exit
PB: predicated region body
PF: predicated region fallthrough
CT: control target
= control target key end

     0   :  { %10 = vsyncpa [#allocation3], 0  ;;  %s1095_s0 = inlined_call_operand.vmem [shape: f32[16,256], index: 0, kind: input, shape index: {}]   ;;  %s1096_s1 = inlined_call_operand.vmem [shape: f32[256,32], index: 1, kind: input, shape index: {}]   ;;  %s1097_s2 = inlined_call_operand.vmem [shape: f32[32,256], index: 2, kind: input, shape index: {}]   ;;  %s1098_s3 = inlined_call_operand.vmem [shape: f32[2,16,16], index: 3, kind: input, shape index: {}]   ;;  %s1099_s4 = inlined_call_operand.vmem [shape: f32[2,16,1], index: 4, kind: input, shape index: {}]   ;;  %s1100_s5 = inlined_call_operand.hbm [shape: f32[16,256], index: 5, kind: output, shape index: {}]  }
   0x1   :  { %12 = vsyncpa [#allocation3 + $0x1], 0  ;;  %s845_s18 = smov 0   ;;  %s847_s19 = smov 0  }
   0x2   :  { %s849_s20 = smov 0   ;;  %s851_s21 = smov 0  }
   0x3 LB: > { %s866_s22 = sadd.s32 4294967295, %s810_s21   ;;  %s656_s23 = sadd.s32 4294967294, %s810_s21   ;;  %s810_s21 = sphi %s851_s21, %s1106_s21   ;;  %s806_s20 = sphi %s849_s20, %s1105_s20   ;;  %s802_s19 = sphi %s847_s19, %s1104_s19   ;;  %s798_s18 = sphi %s845_s18, %s1103_s18  }
   0x4   : > { %s870_s24 = sadd.s32 1, %s810_s21   ;;  %s135_s25 = sadd.s32 1, %s806_s20 }
   0x5   : > { %s132_s26 = ssub.s32 %s810_s21, %s870_s24  ;;  %p145_p0 = scmp.ne.s32.totalorder %s806_s20, %s802_s19 }
   0x6   : > { %p133_p1 = scmp.eq.s32.totalorder %s132_s26, 0  ;;  %p146_p2 = scmp.eq.s32.totalorder %s866_s22, 1 }
   0x7   : > { %p151_p3 = scmp.ne.s32.totalorder %s802_s19, %s798_s18  ;;  %p152_p4 = scmp.eq.s32.totalorder %s656_s23, 1 }
   0x8   : > { %s881_s27 = scalar_select %p133_p1, %s806_s20, %s135_s25  }
   0x9   : > { %p883_p5 = por %p146_p2, %p145_p0  ;;  %p887_p6 = por %p152_p4, %p151_p3 }
   0xa   : > { %p659_p7 = scmp.ge.s32.totalorder %s810_s21, 1  ;;  %p190_p8 = scmp.lt.s32.totalorder %s810_s21, 3 }
   0xc   : > { %p191_p9 = pnand %p659_p7, %p190_p8 }
   0xd   : > { %p218_p10 = scmp.lt.s32.totalorder (!%p191_p9), %s866_s22, 1  ;;  %s814_s25 = smov (!%p191_p9), 112  }
   0xe   : > { %194 = sbr.rel (%p191_p9) target bundleno = 919 (0x397), region = 40  ;;  %s215_s11 = sand.u32 (!%p191_p9), 1, %s802_s19  }
   0xf   : > { %s660_s12 = sshll.u32 (!%p191_p9), %s215_s11, 4  ;;  %s684_s13 = sshll.u32 (!%p191_p9), %s866_s22, 4 }
  0x10   : > { %s592_s16 = scalar_lea.hbm (!%p191_p9), %s1100_s5, %s684_s13  ;;  %s217_s23 = scalar_lea.vmem (!%p191_p9), [#allocation2], %s660_s12 }
  0x11   : > { %s596_s26 = sshll.u32 (!%p191_p9), %s592_s16, 4  ;;  %s768_s8 = scalar_lea.hbm (!%p191_p9), %s1100_s5, 32  ;;  %s597_s26 = int_to_ptr.hbm [resolvable:$true] %s596_s26 }
  0x13   : > { %v240_v0 = vld [vmem:[%s1096_s1 + $0x78] sm:$0xff]  ;;  %v239_v2 = vld [vmem:[%s1096_s1 + $0x70] sm:$0xff]  ;;  %v238_v4 = vld [vmem:[%s1096_s1 + $0x68] sm:$0xff]  ;;  %s219_s17 = scalar_select %p218_p10, %s866_s22, 1  ;;  %vm297_vm0 = vcmask 130048   ;;  %v812_v39 = vmov 16.0  }
  0x14   : > { %v256_v1 = vld [vmem:[%s1096_s1 + $0xf8] sm:$0xff]  ;;  %257 = vmatpush.msra.mxu0 %v240_v0  ;;  %v255_v3 = vld [vmem:[%s1096_s1 + $0xf0] sm:$0xff]  ;;  %v254_v5 = vld [vmem:[%s1096_s1 + $0xe8] sm:$0xff]  ;;  %730 = vrcp.f32 %v812_v39  ;;  %v813_v41 = vmov 0   ;;  %s581_s22 = scalar_lea.sflag [#allocation3], %s215_s11 }
  0x15   : > { %277 = vmatpush.msra.mxu1 %v256_v1  ;;  %v237_v6 = vld [vmem:[%s1096_s1 + $0x60] sm:$0xff]  ;;  %v236_v8 = vld [vmem:[%s1096_s1 + $0x58] sm:$0xff]  ;;  %v235_v10 = vld [vmem:[%s1096_s1 + $0x50] sm:$0xff]  ;;  %s683_s10 = sshll.u32 %s219_s17, 4  ;;  %727 = vset.pattern.permute.xlu1 %v813_v41  ;;  %s762_s17 = sshra.s32 %s597_s26, 4  ;;  %s763_s17 = int_to_ptr.hbm [resolvable:$true] %s762_s17 }
  0x16   : > { %258 = vmatpush.msra.mxu0 %v239_v2  ;;  %v253_v7 = vld [vmem:[%s1096_s1 + $0xe0] sm:$0xff]  ;;  %v252_v9 = vld [vmem:[%s1096_s1 + $0xd8] sm:$0xff]  ;;  %v251_v11 = vld [vmem:[%s1096_s1 + $0xd0] sm:$0xff]  ;;  %s222_s30 = scalar_lea.vmem %s1095_s0, %s683_s10  ;;  %729 = vset.pattern.permute.xlu0 %v813_v41  ;;  %p769_p0 = scmp.lt.s32.totalorder %s763_s17, %s1100_s5 }
  0x17   : > { %278 = vmatpush.msra.mxu1 %v255_v3  ;;  %v234_v12 = vld [vmem:[%s1096_s1 + $0x48] sm:$0xff]  ;;  %v233_v14 = vld [vmem:[%s1096_s1 + $0x40] sm:$0xff]  ;;  %v232_v16 = vld [vmem:[%s1096_s1 + $0x38] sm:$0xff]  ;;  %728 = vset.pattern.permute.xlu2 %v813_v41 }
  0x18   : > { %259 = vmatpush.msra.mxu0 %v238_v4  ;;  %v250_v13 = vld [vmem:[%s1096_s1 + $0xc8] sm:$0xff]  ;;  %v249_v15 = vld [vmem:[%s1096_s1 + $0xc0] sm:$0xff]  ;;  %v248_v17 = vld [vmem:[%s1096_s1 + $0xb8] sm:$0xff] }
  0x19   : > { %279 = vmatpush.msra.mxu1 %v254_v5  ;;  %v231_v18 = vld [vmem:[%s1096_s1 + $0x30] sm:$0xff]  ;;  %v230_v20 = vld [vmem:[%s1096_s1 + $0x28] sm:$0xff]  ;;  %v229_v22 = vld [vmem:[%s1096_s1 + $0x20] sm:$0xff] }
  0x1a   : > { %260 = vmatpush.msra.mxu0 %v237_v6  ;;  %v247_v19 = vld [vmem:[%s1096_s1 + $0xb0] sm:$0xff]  ;;  %v246_v21 = vld [vmem:[%s1096_s1 + $0xa8] sm:$0xff]  ;;  %v245_v23 = vld [vmem:[%s1096_s1 + $0xa0] sm:$0xff]  ;;  %v731_v42 = vpop.eup %730 }
  0x1b   : > { %280 = vmatpush.msra.mxu1 %v253_v7  ;;  %v228_v24 = vld [vmem:[%s1096_s1 + $0x18] sm:$0xff]  ;;  %v227_v26 = vld [vmem:[%s1096_s1 + $0x10] sm:$0xff]  ;;  %v226_v28 = vld [vmem:[%s1096_s1 + $0x8] sm:$0xff]  ;;  %v302_v43 = vmul.f32 16.0, %v731_v42  ;;  %vm306_vm1 = vweird.f32 %v731_v42 }
  0x1c   : > { %261 = vmatpush.msra.mxu0 %v236_v8  ;;  %v244_v25 = vld [vmem:[%s1096_s1 + $0x98] sm:$0xff]  ;;  %v243_v27 = vld [vmem:[%s1096_s1 + $0x90] sm:$0xff]  ;;  %v242_v29 = vld [vmem:[%s1096_s1 + $0x88] sm:$0xff] }
  0x1d   : > { %281 = vmatpush.msra.mxu1 %v252_v9  ;;  %v225_v30 = vld [vmem:[%s1096_s1] sm:$0xff]  ;;  %v996_v33 = vld [vmem:[%s222_s30 + $0x8] sm:$0xff]  ;;  %v303_v45 = vsub.f32 1.0, %v302_v43 }
  0x1e   : > { %262 = vmatpush.msra.mxu0 %v235_v10  ;;  %v241_v31 = vld [vmem:[%s1096_s1 + $0x80] sm:$0xff]  ;;  %v319_v44 = vld [vmem:[%s1099_s4 + $0x8] sm:$0xff] }
  0x1f   : > { %282 = vmatpush.msra.mxu1 %v251_v11  ;;  %v994_v32 = vld [vmem:[%s222_s30] sm:$0xff]  ;;  %v304_v46 = vmul.f32 %v731_v42, %v303_v45  ;;  %v314_v54 = vld [vmem:[%s1098_s3 + $0x8] sm:$0xff]  ;;  %v665_v11 = vld [vmem:[%s1099_s4 + $0x10] sm:$0xff]  ;;  %s764_s30 = scalar_lea.hbm %s763_s17, 16 }
  0x20   : > { %263 = vmatpush.msra.mxu0 %v234_v12  ;;  %v309_v38 = vmax.f32 %v994_v32, %v996_v33  ;;  %v318_v40 = vld [vmem:[%s1099_s4] sm:$0xff]  ;;  %388 = vperm.xlu2 %728, %v665_v11   ;;  %v666_v12 = vld [vmem:[%s1099_s4 + $0x18] sm:$0xff]  ;;  %p765_p11 = scmp.ne.s32.totalorder %s763_s17, %s764_s30  ;;  %p770_p1 = scmp.lt.s32.totalorder %s768_s8, %s764_s30 }
  0x21   : > { %283 = vmatpush.msra.mxu1 %v250_v13  ;;  %325 = vperm.xlu1 %727, %v318_v40   ;;  %v305_v47 = vadd.f32 %v731_v42, %v304_v46  ;;  %v313_v53 = vld [vmem:[%s1098_s3] sm:$0xff] }
  0x22   : > { %264 = vmatpush.msra.mxu0 %v233_v14  ;;  %v663_v14 = vld [vmem:[%s1098_s3 + $0x10] sm:$0xff]  ;;  %p766_p12 = pnand %p765_p11, %p883_p5  ;;  %p771_p2 = por %p770_p1, %p769_p0 }
  0x23   : > { %284 = vmatpush.msra.mxu1 %v249_v15  ;;  %v307_v49 = vsel %vm306_vm1, %v731_v42, %v305_v47  ;;  %v664_v15 = vld [vmem:[%s1098_s3 + $0x18] sm:$0xff] }
  0x24   : > { %265 = vmatpush.msra.mxu0 %v232_v16  ;;  %v465_v16 = vld [vmem:[%s1097_s2 + $0x10] sm:$0xff]  ;;  %p767_p13 = pneg %p766_p12 }
  0x25   : > { %285 = vmatpush.msra.mxu1 %v248_v17  ;;  %v466_v17 = vld [vmem:[%s1097_s2 + $0x18] sm:$0xff] }
  0x26   : > { %266 = vmatpush.msra.mxu0 %v231_v18  ;;  %v463_v18 = vld [vmem:[%s1097_s2] sm:$0xff]  ;;  %p772_p3 = pnand %p771_p2, %p767_p13 }
  0x27   : > { %286 = vmatpush.msra.mxu1 %v247_v19  ;;  %v464_v19 = vld [vmem:[%s1097_s2 + $0x8] sm:$0xff] }
  0x28   : > { %267 = vmatpush.msra.mxu0 %v230_v20  ;;  %393 = vperm.xlu2 %728, %v666_v12  }
  0x29   : > { %287 = vmatpush.msra.mxu1 %v246_v21  ;;  %v512_v21 = vld [vmem:[%s1097_s2 + $0x30] sm:$0xff] }
  0x2a   : > { %268 = vmatpush.msra.mxu0 %v229_v22  ;;  %v513_v22 = vld [vmem:[%s1097_s2 + $0x38] sm:$0xff] }
  0x2b   : > { %288 = vmatpush.msra.mxu1 %v245_v23  ;;  %v510_v23 = vld [vmem:[%s1097_s2 + $0x20] sm:$0xff] }
  0x2c   : > { %269 = vmatpush.msra.mxu0 %v228_v24 }
  0x2d   : > { %289 = vmatpush.msra.mxu1 %v244_v25  ;;  %v511_v25 = vld [vmem:[%s1097_s2 + $0x28] sm:$0xff] }
  0x2e   : > { %270 = vmatpush.msra.mxu0 %v227_v26 }
  0x2f   : > { %290 = vmatpush.msra.mxu1 %v243_v27 }
  0x30   : > { %271 = vmatpush.msra.mxu0 %v226_v28 }
  0x31   : > { %291 = vmatpush.msra.mxu1 %v242_v29 }
  0x32   : > { %272 = vmatpush.msra.mxu0 %v225_v30 }
  0x33   : > { %292 = vmatpush.msra.mxu1 %v241_v31  ;;  %273 = vmatmul.f32.vlgmr.msra.gmra.mxu0 %v994_v32 }
  0x34   : > { %293 = vmatmul.f32.vlgmr.msra.gmra.mxu1 %v996_v33 }
  0x7a   : > { %v389_v20 = vpop.permute.xlu2 %388 }
  0x82   : > { %v394_v28 = vpop.permute.xlu2 %393 }
  0x93   : > { %v326_v55 = vpop.permute.xlu1 %325 }
  0xb0   : > { %v274_v34 = vpop.f32.mrf.mxu0 }
  0xb1   : > { %v294_v35 = vpop.f32.mrf.mxu1 }
  0xb2   : > { %v295_v36 = vadd.f32 %v294_v35, %v274_v34 }
  0xb4   : > { %v298_v37 = vsel %vm297_vm0, %v295_v36, 0.0 }
  0xb5   : > { %299 = vadd.xlane.f32.xlu0 %v298_v37 }
  0xbd   : > { %310 = vmax.xlane.f32.xlu0 %v309_v38 }
  0xd1   : > { %330 = vperm.xlu0 %729, %v319_v44  }
 0x128   : > { %v300_v48 = vpop.xlane.xlu0 %299 }
 0x129   : > { %v308_v50 = vmul.f32 %v307_v49, %v300_v48 }
 0x130   : > { %v311_v51 = vpop.xlane.xlu0 %310 }
 0x131   : > { %v312_v52 = vadd.f32 %v311_v51, %v308_v50 }
 0x133   : > { %353 = vmatpush.msra.mxu2 %v312_v52 }
 0x135   : > { %354 = vmatpush.msra.mxu2 %v295_v36 }
 0x136   : > { %667 = vmatmul.msk.f32.vlgmr.msra.gmra.mxu2 %vm297_vm0, %v313_v53 }
 0x137   : > { %484 = vmatpush.msrb.mxu2 %v465_v16 }
 0x139   : > { %485 = vmatpush.msrb.mxu2 %v463_v18 }
 0x13b   : > { %531 = vmatpush.msra.mxu2 %v512_v21 }
 0x13d   : > { %532 = vmatpush.msra.mxu2 %v510_v23 }
 0x13e   : > { %668 = vmatmul.msk.f32.gmra.mxu2 %vm297_vm0, %v314_v54 }
 0x143   : > { %v331_v9 = vpop.permute.xlu0 %330 }
 0x1b9   : > { %v356_v56 = vpop.f32.mrf.mxu2 }
 0x1ba   : > { %v357_v57 = vadd.f32 %v356_v56, %v326_v55 }
 0x1bc   : > { %v669_v58 = vmul.f32 -1.442695, %v357_v57 }
 0x1be   : > { %732 = vpow2.f32 %v669_v58 }
 0x1c1   : > { %v359_v8 = vpop.f32.mrf.mxu2 }
 0x1c2   : > { %v360_v10 = vadd.f32 %v359_v8, %v331_v9 }
 0x1c4   : > { %v733_v59 = vpop.eup %732 }
 0x1c5   : > { %v365_v60 = vadd.f32 1.0, %v733_v59 }
 0x1c7   : > { %734 = vrcp.f32 %v365_v60  ;;  %v377_v0 = vand.u32 2147483648, %v365_v60  ;;  %v375_v2 = vand.u32 2147483647, %v365_v60  ;;  %vm371_vm3 = vweird.f32 %v365_v60 }
 0x1c9   : > { %v378_v4 = vor.u32 1.1754944e-38, %v377_v0  ;;  %vm376_vm5 = vcmp.eq.f32.partialorder %v375_v2, 8.507059e+37 }
 0x1cd   : > { %v735_v61 = vpop.eup %734 }
 0x1ce   : > { %v367_v62 = vmul.f32 %v735_v61, %v365_v60  ;;  %vm372_vm2 = vweird.f32 %v735_v61 }
 0x1cf   : > { %vm373_vm4 = vmor %vm371_vm3, %vm372_vm2 }
 0x1d0   : > { %v368_v63 = vsub.f32 1.0, %v367_v62 }
 0x1d2   : > { %v369_v1 = vmul.f32 %v735_v61, %v368_v63 }
 0x1d4   : > { %v370_v3 = vadd.f32 %v735_v61, %v369_v1 }
 0x1d6   : > { %v374_v5 = vsel %vm373_vm4, %v735_v61, %v370_v3 }
 0x1d7   : > { %v379_v6 = vsel %vm376_vm5, %v378_v4, %v374_v5 }
 0x1d8   : > { %v381_v7 = vmul.f32 %v379_v6, %v357_v57 }
 0x1da   : > { %383 = vrot.lane.b32.xlu1 %v381_v7, %s814_s25  ;;  %s594_s25 = sshll.u32 %s217_s23, 4  ;;  %s595_s25 = int_to_ptr.vmem [resolvable:$true] %s594_s25 }
 0x1e2   : > { %561 = vperm.xlu1 %727, %v360_v10  }
 0x24c   : > { %v384_v13 = vpop.permute.xlu1 %383 }
 0x24d   : > { %416 = vmatpush.msra.mxu3 %v384_v13 }
 0x24f   : > { %417 = vmatpush.msra.mxu3 %v381_v7 }
 0x250   : > { %670 = vmatmul.msk.f32.vlgmr.msra.gmra.mxu3 %vm297_vm0, %v663_v14 }
 0x251   : > { %504 = vmatpush.msrb.mxu3 %v466_v17 }
 0x253   : > { %505 = vmatpush.msrb.mxu3 %v464_v19 }
 0x254   : > { %v562_v0 = vpop.permute.xlu1 %561 }
 0x255   : > { %551 = vmatpush.msra.mxu3 %v513_v22 }
 0x257   : > { %552 = vmatpush.msra.mxu3 %v511_v25 }
 0x258   : > { %671 = vmatmul.msk.f32.gmra.mxu3 %vm297_vm0, %v664_v15 }
 0x2d3   : > { %v419_v24 = vpop.f32.mrf.mxu3 }
 0x2d4   : > { %v420_v26 = vadd.f32 %v419_v24, %v389_v20 }
 0x2d6   : > { %v672_v27 = vmul.f32 -1.442695, %v420_v26 }
 0x2d8   : > { %736 = vpow2.f32 %v672_v27 }
 0x2db   : > { %v422_v29 = vpop.f32.mrf.mxu3 }
 0x2dc   : > { %v423_v30 = vadd.f32 %v422_v29, %v394_v28 }
 0x2de   : > { %v737_v31 = vpop.eup %736  ;;  %v673_v34 = vmul.f32 -1.442695, %v423_v30 }
 0x2df   : > { %v431_v35 = vadd.f32 1.0, %v737_v31 }
 0x2e0   : > { %738 = vpow2.f32 %v673_v34 }
 0x2e1   : > { %740 = vrcp.f32 %v431_v35  ;;  %v444_v41 = vand.u32 2147483648, %v431_v35  ;;  %v442_v43 = vand.u32 2147483647, %v431_v35  ;;  %vm438_vm7 = vweird.f32 %v431_v35 }
 0x2e3   : > { %v445_v46 = vor.u32 1.1754944e-38, %v444_v41  ;;  %vm443_vm9 = vcmp.eq.f32.partialorder %v442_v43, 8.507059e+37 }
 0x2e6   : > { %v739_v36 = vpop.eup %738 }
 0x2e7   : > { %v741_v37 = vpop.eup %740  ;;  %v432_v38 = vadd.f32 1.0, %v739_v36 }
 0x2e8   : > { %v434_v39 = vmul.f32 %v741_v37, %v431_v35  ;;  %vm439_vm6 = vweird.f32 %v741_v37 }
 0x2e9   : > { %742 = vrcp.f32 %v432_v38  ;;  %vm440_vm8 = vmor %vm438_vm7, %vm439_vm6  ;;  %v459_v51 = vand.u32 2147483648, %v432_v38  ;;  %v457_v53 = vand.u32 2147483647, %v432_v38  ;;  %vm453_vm11 = vweird.f32 %v432_v38 }
 0x2ea   : > { %v435_v40 = vsub.f32 1.0, %v434_v39 }
 0x2eb   : > { %v460_v55 = vor.u32 1.1754944e-38, %v459_v51  ;;  %vm458_vm13 = vcmp.eq.f32.partialorder %v457_v53, 8.507059e+37 }
 0x2ec   : > { %v436_v42 = vmul.f32 %v741_v37, %v435_v40 }
 0x2ee   : > { %v437_v44 = vadd.f32 %v741_v37, %v436_v42 }
 0x2ef   : > { %v743_v45 = vpop.eup %742 }
 0x2f0   : > { %v449_v47 = vmul.f32 %v743_v45, %v432_v38  ;;  %v441_v48 = vsel %vm440_vm8, %v741_v37, %v437_v44  ;;  %vm454_vm10 = vweird.f32 %v743_v45 }
 0x2f1   : > { %v446_v49 = vsel %vm443_vm9, %v445_v46, %v441_v48  ;;  %vm455_vm12 = vmor %vm453_vm11, %vm454_vm10 }
 0x2f2   : > { %v450_v50 = vsub.f32 1.0, %v449_v47  ;;  %674 = vmatmul.msk.f32.vlgmr.msrb.gmra.mxu2 %vm297_vm0, %v446_v49  ;;  %675 = vmatmul.msk.f32.vlgmr.msrb.gmra.mxu3 %vm297_vm0, %v446_v49 }
 0x2f4   : > { %v451_v52 = vmul.f32 %v743_v45, %v450_v50 }
 0x2f6   : > { %v452_v54 = vadd.f32 %v743_v45, %v451_v52 }
 0x2f8   : > { %v456_v56 = vsel %vm455_vm12, %v743_v45, %v452_v54 }
 0x2f9   : > { %v461_v57 = vsel %vm458_vm13, %v460_v55, %v456_v56 }
 0x2fa   : > { %676 = vmatmul.msk.f32.vlgmr.msra.gmra.mxu2 %vm297_vm0, %v461_v57  ;;  %677 = vmatmul.msk.f32.vlgmr.msra.gmra.mxu3 %vm297_vm0, %v461_v57 }
 0x375   : > { %v487_v58 = vpop.f32.mrf.mxu2  ;;  %v507_v59 = vpop.f32.mrf.mxu3 }
 0x37d   : > { %v534_v60 = vpop.f32.mrf.mxu2  ;;  %v554_v61 = vpop.f32.mrf.mxu3 }
 0x37e   : > { %v557_v62 = vmul.f32 %v534_v60, %v487_v58  ;;  %v558_v63 = vmul.f32 %v554_v61, %v507_v59 }
 0x380   : > { %v564_v1 = vadd.f32 %v562_v0, %v557_v62  ;;  %v565_v2 = vadd.f32 %v562_v0, %v558_v63 }
 0x382   : > { %v566_v3 = vmul.f32 %v564_v1, %v994_v32  ;;  %v567_v4 = vmul.f32 %v565_v2, %v996_v33 }
 0x384   : > { %v568_v5 = vmul.f32 0.5, %v566_v3  ;;  %v569_v6 = vmul.f32 0.5, %v567_v4 }
 0x386   : > { %744 = vtanh.f32 %v568_v5 }
 0x387   : > { %746 = vtanh.f32 %v569_v6 }
 0x38c   : > { %v745_v7 = vpop.eup %744 }
 0x38d   : > { %v747_v8 = vpop.eup %746  ;;  %v572_v9 = vmul.f32 0.5, %v745_v7 }
 0x38e   : > { %v573_v10 = vmul.f32 0.5, %v747_v8 }
 0x38f   : > { %v574_v11 = vadd.f32 0.5, %v572_v9 }
 0x390   : > { %v575_v12 = vadd.f32 0.5, %v573_v10 }
 0x391   : > { %v576_v13 = vmul.f32 %v574_v11, %v994_v32 }
 0x392   : > { %v577_v14 = vmul.f32 %v575_v12, %v996_v33 }
 0x393   : > { %578 = vst [vmem:[%s217_s23] sm:$0xff] %v576_v13 }
 0x394   : > { %579 = vst [vmem:[%s217_s23 + $0x8] sm:$0xff] %v577_v14 }
 0x395   : > { %775 = shalt.err (!%p772_p3)
}
 0x396   : > { %685 = dma.vmem_to_hbm [thread:$0]  (%p883_p5), %s595_s25, 256, %s597_s26, %s581_s22  }
 0x397 PF: > { %p691_p4 = scmp.ge.s32.totalorder %s810_s21, 2  ;;  %s608_s11 = sand.u32 1, %s798_s18  }
 0x398   : > { %s609_s12 = scalar_lea.sflag [#allocation3], %s608_s11 }
 0x399   : > { %p688_p7 = pnand %p691_p4, %p887_p6 }
 0x39b   : > { %p689_p8 = pneg %p688_p7 }
 0x39d   : > { %793 = dma.done.wait (%p689_p8), %s609_s12, 256  }
 0x39e   : > { %795 = vsyncadd (%p689_p8), %s609_s12, 4294967040  ;;  %p15_p9 = scmp.ge.s32.totalorder %s870_s24, 4   ;;  %s1103_s18 = smov %s802_s19 }
 0x39f   : > { %s1104_s19 = smov %s806_s20  ;;  %s1105_s20 = smov %s881_s27 }
 0x3a0   : > { %s1106_s21 = smov %s870_s24  ;;  %17 = sbr.rel (!%p15_p9) target bundleno = 3 (0x3), region = 77 }
 0x3a5   :  { %615 = vsyncpa [#allocation3], 1 }
 0x3a6   :  { %617 = vsyncpa [#allocation3 + $0x1], 1 }

</bundles_post_ra>
